<compile_context>
chip_gen: v6e
topology: v6e:2x2x1
jax: 0.10.0
libtpu: 0.0.40
codegen_flags: <defaults>
</compile_context>

<pallas_src>
import functools

import jax
import jax.numpy as jnp
from jax.experimental import pallas as pl
from jax.experimental.pallas import tpu as pltpu

_EPS = 1e-5
_LANE = 128


def _round_up(x, m):
    return ((x + m - 1) // m) * m


def _vmem_budget_bytes():
    """Generation-aware VMEM budget shared by the tile chooser and vmem_limit_bytes."""
    cap = 64 << 20  # conservative fallback (v7x physical VMEM per TC)
    try:
        cap = int(getattr(pltpu.get_tpu_info(), "vmem_capacity_bytes", cap))
    except Exception:
        pass
    # Leave headroom for the compiler's own scratch; cap at 64 MiB on the big-VMEM
    # generations (v5e/v6e: 128 MiB physical) and ~48 MiB on v7x (64 MiB physical).
    return int(min(max(cap - (16 << 20), 16 << 20), 64 << 20))


def _choose_tile_lanes(b, c, hw, itemsize, vmem_budget_bytes):
    """Largest multiple-of-128 lane tile whose working set fits the VMEM budget.

    Working set per grid step: double-buffered input + output tiles plus ~3 f32
    temporaries of tile size (the fused chain keeps x, mean/var, and the scaled
    result live in f32).  Prefers >= 8 grid steps (pipeline depth) and an even
    step count (v7x has 2 TensorCores sharing the parallel grid).
    """
    hwp = _round_up(hw, _LANE)
    bytes_per_lane = c * (2 * 2 * itemsize + 3 * 4)
    tl = ((vmem_budget_bytes - (1 << 20)) // bytes_per_lane // _LANE) * _LANE
    tl = int(min(max(tl, _LANE), hwp))

    def nsteps(t):
        return b * pl.cdiv(hwp, t)

    # Prefer >= 8 total grid steps when the input is large enough.
    if nsteps(tl) < 8:
        per_batch = pl.cdiv(8, b)
        tl_cap = max(_LANE, (hwp // per_batch) // _LANE * _LANE)
        tl = min(tl, tl_cap)

    # Prefer an even step count so both v7x TensorCores get equal work.
    if nsteps(tl) % 2 and tl > _LANE:
        for cand in range(tl - _LANE, _LANE - 1, -_LANE):
            if nsteps(cand) % 2 == 0:
                tl = cand
                break
    return tl


def _fused_backbone_kernel(x_ref, w_ref, o_ref, *, num_blocks, inv_c):
    """Apply `num_blocks` BiasFree_LayerNorms to one (1, C, TL) NCHW tile.

    C is the sublane axis (reduced), TL (a slice of H*W) is the lane axis.
    Padded lane columns are all-zero and stay zero (0 / sqrt(0 + eps) * w = 0).
    """
    x = x_ref[...].astype(jnp.float32)  # (1, C, TL); all math in f32, cast once on store
    # Static Python loop -> fully unrolled at trace time (small `num`), statically
    # indexed weights, no per-iteration dynamic loads.
    for k in range(num_blocks):
        w = w_ref[k][None].astype(jnp.float32)               # (1, C, 1), lane-broadcast
        mu = jnp.sum(x, axis=1, keepdims=True) * inv_c        # (1, 1, TL) sublane reduce
        d = x - mu
        var = jnp.sum(d * d, axis=1, keepdims=True) * inv_c   # two-pass variance
        # PyTorch BiasFree_LayerNorm: x / sqrt(var + eps) * weight (no mean-centering).
        x = x * jax.lax.rsqrt(var + _EPS) * w
    o_ref[...] = x.astype(o_ref.dtype)


def backbone_block(x, weights, *, tile_lanes=None, vmem_budget_bytes=None):
    """BackBoneBlock.forward: apply len(weights) BiasFree_LayerNorm blocks sequentially.

    x: (B, C, H, W); weights: list of (C,) per-block scale parameters.
    Returns the same shape/dtype as x.  The whole chain is fused into a single
    pallas_call operating in native NCHW layout.
    """
    B, C, H, W = x.shape
    num = len(weights)
    HW = H * W

    budget = int(vmem_budget_bytes) if vmem_budget_bytes is not None else _vmem_budget_bytes()
    itemsize = jnp.dtype(x.dtype).itemsize
    tl = int(tile_lanes) if tile_lanes is not None else _choose_tile_lanes(
        B, C, HW, itemsize, budget)

    # Free reshape (no permute): H*W becomes the lane axis, C stays on sublanes.
    x3 = x.reshape(B, C, HW)
    HWp = _round_up(HW, tl)
    xp = x3 if HWp == HW else jnp.pad(x3, ((0, 0), (0, 0), (0, HWp - HW)))

    # (num, C, 1) weight stack: resident in VMEM for the whole grid.
    w_stack = jnp.stack([jnp.asarray(w, dtype=jnp.float32) for w in weights]).reshape(num, C, 1)

    kernel = functools.partial(_fused_backbone_kernel, num_blocks=num, inv_c=1.0 / C)
    out = pl.pallas_call(
        kernel,
        out_shape=jax.ShapeDtypeStruct((B, C, HWp), x.dtype),
        grid_spec=pltpu.PrefetchScalarGridSpec(
            num_scalar_prefetch=0,
            grid=(B, HWp // tl),
            in_specs=[
                pl.BlockSpec((1, C, tl), lambda b, j: (b, 0, j)),      # NCHW tile
                pl.BlockSpec((num, C, 1), lambda b, j: (0, 0, 0)),     # resident weights
            ],
            out_specs=pl.BlockSpec((1, C, tl), lambda b, j: (b, 0, j)),
        ),
        compiler_params=pltpu.CompilerParams(
            dimension_semantics=("parallel", "parallel"),  # independent tiles -> megacore
            vmem_limit_bytes=budget,                       # same budget as the tile chooser
        ),
    )(xp, w_stack)

    out = out if HWp == HW else out[:, :, :HW]
    return out.reshape(B, C, H, W)


if __name__ == "__main__":
    key = jax.random.PRNGKey(0)
    B, C, H, W = 2, 32, 16, 16
    num_blocks = 2

    kx, kw = jax.random.split(key)
    # Non-zero mean exercises the (two-pass) mean-subtracted variance path.
    x = 2.0 + jax.random.normal(kx, (B, C, H, W), dtype=jnp.float32)
    wkeys = jax.random.split(kw, num_blocks)
    weights = [1.0 + 0.1 * jax.random.normal(k, (C,), dtype=jnp.float32) for k in wkeys]

    out = backbone_block(x, weights)
    out = jax.block_until_ready(out)

    # Pure-JAX reference (PyTorch BiasFree_LayerNorm semantics, applied sequentially).
    def ref_block(x4, w):
        x3 = jnp.transpose(x4, (0, 2, 3, 1))  # (B, H, W, C)
        mu = jnp.mean(x3, axis=-1, keepdims=True)
        var = jnp.mean((x3 - mu) ** 2, axis=-1, keepdims=True)
        y = x3 / jnp.sqrt(var + _EPS) * w
        return jnp.transpose(y, (0, 3, 1, 2))

    ref = x
    for w in weights:
        ref = ref_block(ref, w)

    assert out.shape == x.shape and out.dtype == x.dtype
    err = float(jnp.max(jnp.abs(out - ref)))
    assert jnp.allclose(out, ref, atol=1e-4, rtol=1e-4), err
    print("KERNEL_OK")
</pallas_src>

<mosaic_0001>
module attributes {stable_mosaic.version = 11 : i64} {
  func.func @_fused_backbone_kernel(%arg0: i32, %arg1: i32, %arg2: memref<1x32x128xf32, #tpu.memory_space<vmem>>, %arg3: memref<2x32x1xf32, #tpu.memory_space<vmem>>, %arg4: memref<1x32x128xf32, #tpu.memory_space<vmem>>) attributes {dimension_semantics = [#tpu.dimension_semantics<parallel>, #tpu.dimension_semantics<parallel>], iteration_bounds = array<i64: 2, 2>, scalar_prefetch = 0 : i64, scratch_operands = 0 : i64, tpu.core_type = #tpu.core_type<tc>, window_params = [{transform_indices = @transform_0, window_bounds = array<i64: 1, 32, 128>}, {pipeline_mode = #tpu.pipeline_mode<synchronous>, transform_indices = @transform_1, window_bounds = array<i64: 2, 32, 1>}, {transform_indices = @transform_2, window_bounds = array<i64: 1, 32, 128>}]} {
    %c0 = arith.constant 0 : index
    %c0_0 = arith.constant 0 : index
    %c0_1 = arith.constant 0 : index
    %0 = vector.load %arg2[%c0, %c0_0, %c0_1] : memref<1x32x128xf32, #tpu.memory_space<vmem>>, vector<1x32x128xf32>
    %c0_2 = arith.constant 0 : index
    %c0_3 = arith.constant 0 : index
    %c0_4 = arith.constant 0 : index
    %1 = vector.load %arg3[%c0_2, %c0_3, %c0_4] : memref<2x32x1xf32, #tpu.memory_space<vmem>>, vector<1x32x1xf32>
    %2 = vector.shape_cast %1 : vector<1x32x1xf32> to vector<32x1xf32>
    %3 = vector.shape_cast %2 : vector<32x1xf32> to vector<1x32x1xf32>
    %cst = arith.constant dense<0.000000e+00> : vector<1x128xf32>
    %4 = vector.multi_reduction <add>, %0, %cst [1] : vector<1x32x128xf32> to vector<1x128xf32>
    %5 = vector.shape_cast %4 : vector<1x128xf32> to vector<1x1x128xf32>
    %cst_5 = arith.constant 3.125000e-02 : f32
    %6 = vector.broadcast %cst_5 : f32 to vector<1x1x128xf32>
    %7 = arith.mulf %5, %6 : vector<1x1x128xf32>
    %8 = vector.broadcast %7 : vector<1x1x128xf32> to vector<1x32x128xf32>
    %9 = arith.subf %0, %8 : vector<1x32x128xf32>
    %10 = arith.mulf %9, %9 : vector<1x32x128xf32>
    %cst_6 = arith.constant dense<0.000000e+00> : vector<1x128xf32>
    %11 = vector.multi_reduction <add>, %10, %cst_6 [1] : vector<1x32x128xf32> to vector<1x128xf32>
    %12 = vector.shape_cast %11 : vector<1x128xf32> to vector<1x1x128xf32>
    %cst_7 = arith.constant 3.125000e-02 : f32
    %13 = vector.broadcast %cst_7 : f32 to vector<1x1x128xf32>
    %14 = arith.mulf %12, %13 : vector<1x1x128xf32>
    %cst_8 = arith.constant 9.99999974E-6 : f32
    %15 = vector.broadcast %cst_8 : f32 to vector<1x1x128xf32>
    %16 = arith.addf %14, %15 : vector<1x1x128xf32>
    %17 = math.rsqrt %16 : vector<1x1x128xf32>
    %18 = vector.broadcast %17 : vector<1x1x128xf32> to vector<1x32x128xf32>
    %19 = arith.mulf %0, %18 : vector<1x32x128xf32>
    %20 = vector.broadcast %3 : vector<1x32x1xf32> to vector<1x32x128xf32>
    %21 = arith.mulf %19, %20 : vector<1x32x128xf32>
    %c1 = arith.constant 1 : index
    %c0_9 = arith.constant 0 : index
    %c0_10 = arith.constant 0 : index
    %22 = vector.load %arg3[%c1, %c0_9, %c0_10] : memref<2x32x1xf32, #tpu.memory_space<vmem>>, vector<1x32x1xf32>
    %23 = vector.shape_cast %22 : vector<1x32x1xf32> to vector<32x1xf32>
    %24 = vector.shape_cast %23 : vector<32x1xf32> to vector<1x32x1xf32>
    %cst_11 = arith.constant dense<0.000000e+00> : vector<1x128xf32>
    %25 = vector.multi_reduction <add>, %21, %cst_11 [1] : vector<1x32x128xf32> to vector<1x128xf32>
    %26 = vector.shape_cast %25 : vector<1x128xf32> to vector<1x1x128xf32>
    %cst_12 = arith.constant 3.125000e-02 : f32
    %27 = vector.broadcast %cst_12 : f32 to vector<1x1x128xf32>
    %28 = arith.mulf %26, %27 : vector<1x1x128xf32>
    %29 = vector.broadcast %28 : vector<1x1x128xf32> to vector<1x32x128xf32>
    %30 = arith.subf %21, %29 : vector<1x32x128xf32>
    %31 = arith.mulf %30, %30 : vector<1x32x128xf32>
    %cst_13 = arith.constant dense<0.000000e+00> : vector<1x128xf32>
    %32 = vector.multi_reduction <add>, %31, %cst_13 [1] : vector<1x32x128xf32> to vector<1x128xf32>
    %33 = vector.shape_cast %32 : vector<1x128xf32> to vector<1x1x128xf32>
    %cst_14 = arith.constant 3.125000e-02 : f32
    %34 = vector.broadcast %cst_14 : f32 to vector<1x1x128xf32>
    %35 = arith.mulf %33, %34 : vector<1x1x128xf32>
    %cst_15 = arith.constant 9.99999974E-6 : f32
    %36 = vector.broadcast %cst_15 : f32 to vector<1x1x128xf32>
    %37 = arith.addf %35, %36 : vector<1x1x128xf32>
    %38 = math.rsqrt %37 : vector<1x1x128xf32>
    %39 = vector.broadcast %38 : vector<1x1x128xf32> to vector<1x32x128xf32>
    %40 = arith.mulf %21, %39 : vector<1x32x128xf32>
    %41 = vector.broadcast %24 : vector<1x32x1xf32> to vector<1x32x128xf32>
    %42 = arith.mulf %40, %41 : vector<1x32x128xf32>
    %c0_16 = arith.constant 0 : index
    %c0_17 = arith.constant 0 : index
    %c0_18 = arith.constant 0 : index
    %43 = vector.load %arg4[%c0_16, %c0_17, %c0_18] : memref<1x32x128xf32, #tpu.memory_space<vmem>>, vector<1x32x128xf32>
    tpu.vector_store %arg4[%c0_16, %c0_17, %c0_18], %42 {strides = array<i32>} : memref<1x32x128xf32, #tpu.memory_space<vmem>>, vector<1x32x128xf32>,
    return
  }
  func.func @transform_0(%arg0: i32, %arg1: i32) -> (i32, i32, i32) {
    %c0_i32 = arith.constant 0 : i32
    %c0_i32_0 = arith.constant 0 : i32
    return %arg0, %c0_i32, %arg1 : i32, i32, i32
  }
  func.func @transform_1(%arg0: i32, %arg1: i32) -> (i32, i32, i32) {
    %c0_i32 = arith.constant 0 : i32
    %c0_i32_0 = arith.constant 0 : i32
    %c0_i32_1 = arith.constant 0 : i32
    %c0_i32_2 = arith.constant 0 : i32
    return %c0_i32, %c0_i32_0, %c0_i32_1 : i32, i32, i32
  }
  func.func @transform_2(%arg0: i32, %arg1: i32) -> (i32, i32, i32) {
    %c0_i32 = arith.constant 0 : i32
    %c0_i32_0 = arith.constant 0 : i32
    return %arg0, %c0_i32, %arg1 : i32, i32, i32
  }
}

</mosaic_0001>

<bundles_post_ra>
// kernel: tpu_custom_call.1
= control target key start
LH: loop header
LB: loop body
LE: loop exit
PB: predicated region body
PF: predicated region fallthrough
CT: control target
= control target key end

     0   :  { %7 = vsyncpa [#allocation3], 0  ;;  %s869_s0 = inlined_call_operand.hbm [shape: f32[2,32,256], index: 0, kind: input, shape index: {}]   ;;  %s870_s1 = inlined_call_operand.vmem [shape: f32[2,32,1], index: 1, kind: input, shape index: {}]   ;;  %s871_s2 = inlined_call_operand.hbm [shape: f32[2,32,256], index: 2, kind: output, shape index: {}]  }
   0x1   :  { %9 = vsyncpa [#allocation3 + $0x1], 0 }
   0x2   :  { %10 = vsyncpa [#allocation4], 0 }
   0x3   :  { %12 = vsyncpa [#allocation4 + $0x1], 0  ;;  %s675_s9 = smov 0   ;;  %s677_s10 = smov 0  }
   0x4   :  { %s679_s11 = smov 0   ;;  %s681_s12 = smov 0  }
   0x5   :  { %s683_s13 = smov 0   ;;  %s685_s14 = smov 0  }
   0x6   :  { %s687_s15 = smov 0   ;;  %s689_s16 = smov 0  }
   0x7 LB: > { %s415_s17 = sadd.s32 4294967295, %s649_s16   ;;  %s416_s18 = sadd.s32 4294967294, %s649_s16   ;;  %s649_s16 = sphi %s689_s16, %s18_s16   ;;  %s645_s15 = sphi %s687_s15, %s886_s15   ;;  %s641_s14 = sphi %s685_s14, %s885_s14   ;;  %s637_s13 = sphi %s683_s13, %s884_s13   ;;  %s633_s12 = sphi %s681_s12, %s883_s12   ;;  %s629_s11 = sphi %s679_s11, %s882_s11   ;;  %s625_s10 = sphi %s677_s10, %s881_s10   ;;  %s621_s9 = sphi %s675_s9, %s880_s9  }
   0x8   : > { %s27_s19 = sadd.s32 1, %s641_s14  ;;  %s30_s20 = sadd.s32 1, %s645_s15 }
   0x9   : > { %p28_p0 = scmp.ge.s32.totalorder %s27_s19, 2  ;;  %s39_s21 = sadd.s32 1, %s629_s11 }
   0xa   : > { %p46_p1 = scmp.ne.s32.totalorder %s629_s11, %s625_s10  ;;  %p47_p2 = scmp.eq.s32.totalorder %s649_s16, 0 }
   0xb   : > { %s888_s19 = smov (%p28_p0, %s27_s19), 0  ;;  %s890_s20 = smov (!%p28_p0, %s30_s20), %s645_s15 }
   0xc   : > { %s35_s22 = ssub.s32 %s641_s14, %s888_s19  ;;  %p728_p3 = por %p47_p2, %p46_p1 }
   0xd   : > { %p32_p4 = scmp.ge.s32.totalorder %s890_s20, 2  ;;  %p52_p5 = scmp.ne.s32.totalorder %s625_s10, %s621_s9 }
   0xe   : > { %p53_p6 = scmp.eq.s32.totalorder %s415_s17, 0  ;;  %p99_p7 = scmp.eq.s32.totalorder %s415_s17, 3 }
   0xf   : > { %s892_s20 = smov (%p32_p4, %s890_s20), 0  ;;  %p105_p10 = scmp.eq.s32.totalorder %s416_s18, 3 }
  0x10   : > { %874 = sst [smem:[#allocation8_spill]] %s892_s20  ;;  %p736_p8 = por %p53_p6, %p52_p5 }
  0x11   : > { %p740_p9 = por %p99_p7, %p46_p1  ;;  %s34_s26 = ssub.s32 %s645_s15, %s892_s20 }
  0x12   : > { %s36_s27 = sor.u32 %s35_s22, %s34_s26  ;;  %p746_p12 = por %p105_p10, %p52_p5 }
  0x13   : > { %p37_p11 = scmp.eq.s32.totalorder %s36_s27, 0  ;;  %p446_p13 = scmp.lt.s32.totalorder %s649_s16, 4 }
  0x14   : > { %s128_s29 = sand.u32 1, %s629_s11   ;;  %s420_s4 = sshll.u32 %s645_s15, 3 }
  0x15   : > { %s753_s30 = scalar_select %p37_p11, %s629_s11, %s39_s21  }
  0x16   : > { %s419_s3 = sshll.u32 %s128_s29, 5  ;;  %s137_s5 = sadd.s32 %s641_s14, %s420_s4 }
  0x17   : > { %s132_s6 = scalar_lea.vmem [#allocation2], %s419_s3  ;;  %s421_s8 = sshll.u32 %s137_s5, 7 }
  0x18   : > { %s140_s7 = sshll.u32 %s132_s6, 4  ;;  %s139_s18 = scalar_lea.hbm %s869_s0, %s421_s8  ;;  %s141_s7 = int_to_ptr.vmem [resolvable:$true] %s140_s7 }
  0x19   : > { %p762_p0 = pnand %p446_p13, %p728_p3  ;;  %s129_s26 = scalar_lea.sflag [#allocation3], %s128_s29 }
  0x1a   : > { %s538_s21 = scalar_lea.vmem %s141_s7, 512  ;;  %s651_s27 = smov [#allocation2]  }
  0x1b   : > { %p527_p1 = pneg %p762_p0  ;;  %p539_p2 = scmp.ne.s32.totalorder %s141_s7, %s538_s21 }
  0x1c   : > { %s543_s3 = sshll.u32 %s651_s27, 4  ;;  %s544_s3 = int_to_ptr.vmem [resolvable:$false] %s543_s3 }
  0x1d   : > { %p541_p4 = pnand %p539_p2, %p527_p1  ;;  %s545_s4 = scalar_lea.vmem %s544_s3, 1024 }
  0x1e   : > { %p546_p6 = scmp.lt.s32.totalorder %s141_s7, %s544_s3  ;;  %p547_p7 = scmp.lt.s32.totalorder %s545_s4, %s538_s21 }
  0x1f   : > { %p542_p5 = pneg %p541_p4 }
  0x20   : > { %p548_p10 = por %p547_p7, %p546_p6 }
  0x22   : > { %p549_p11 = pnand %p548_p10, %p542_p5 }
  0x24   : > { %552 = shalt.err (!%p549_p11)
}
  0x25   : > { %s652_s20 = smov 256   ;;  %s653_s23 = smov 128  }
  0x26   : > { %s654_s29 = smov 8   ;;  %p422_p3 = scmp.ge.s32.totalorder %s649_s16, 1 }
  0x27   : > { %441 = dma.hbm_to_vmem [thread:$0]  (!%p762_p0), %s139_s18, 512, %s141_s7, %s129_s26, %s652_s20, %s653_s23, %s654_s29  }
  0x28   : > { %p148_p13 = scmp.lt.s32.totalorder %s649_s16, 5 }
  0x2a   : > { %p149_p1 = pnand %p422_p3, %p148_p13 }
  0x2b   : > { %s773_s5 = sand.u32 (!%p149_p1), 1, %s625_s10  }
  0x2c   : > { %152 = sbr.rel (%p149_p1) target bundleno = 262 (0x106), region = 28  ;;  %s423_s6 = sshll.u32 (!%p149_p1), %s773_s5, 5 }
  0x2d   : > { %s155_s8 = scalar_lea.sflag (!%p149_p1), [#allocation3], %s773_s5  ;;  %s158_s17 = scalar_lea.vmem (!%p149_p1), [#allocation2], %s423_s6 }
  0x31   : > { %612 = dma.done.wait (%p736_p8), %s155_s8, 512  }
  0x32   : > { %614 = vsyncadd (%p736_p8), %s155_s8, 4294966784  ;;  %v655_v0 = vmov 0   ;;  %v185_v1 = vld [vmem:[%s870_s1 + $0x10] sm:$0xff]  ;;  %v183_v2 = vld [vmem:[%s870_s1] sm:$0xff]  ;;  %s178_s21 = scalar_lea.vmem [#allocation5], %s423_s6  ;;  %s313_s6 = scalar_lea.sflag [#allocation4], %s773_s5 }
  0x33   : > { %520 = vset.pattern.permute.xlu1 %v655_v0  ;;  %519 = vset.pattern.permute.xlu0 %v655_v0  ;;  %v186_v3 = vld [vmem:[%s870_s1 + $0x18] sm:$0xff]  ;;  %v184_v4 = vld [vmem:[%s870_s1 + $0x8] sm:$0xff]  ;;  %v425_v6 = vld [vmem:[%s870_s1 + $0x20] sm:$0xff]  ;;  %s327_s27 = sshll.u32 %s178_s21, 4  ;;  %s656_s20 = smov [#allocation5]   ;;  %s811_s27 = int_to_ptr.vmem [resolvable:$true] %s327_s27 }
  0x34   : > { %233 = vperm.xlu1 %520, %v185_v1   ;;  %223 = vperm.xlu0 %519, %v183_v2   ;;  %v426_v5 = vld [vmem:[%s870_s1 + $0x28] sm:$0xff]  ;;  %v428_v7 = vld [vmem:[%s870_s1 + $0x38] sm:$0xff]  ;;  %v427_v8 = vld [vmem:[%s870_s1 + $0x30] sm:$0xff]  ;;  %s553_s4 = scalar_lea.vmem %s811_s27, 512  ;;  %s557_s23 = sshll.u32 %s656_s20, 4  ;;  %s558_s23 = int_to_ptr.vmem [resolvable:$false] %s557_s23 }
  0x35   : > { %v179_v9 = vld [vmem:[%s158_s17] sm:$0xff]  ;;  %v180_v10 = vld [vmem:[%s158_s17 + $0x8] sm:$0xff]  ;;  %v181_v12 = vld [vmem:[%s158_s17 + $0x10] sm:$0xff]  ;;  %p554_p8 = scmp.ne.s32.totalorder %s811_s27, %s553_s4  ;;  %s559_s29 = scalar_lea.vmem %s558_s23, 1024 }
  0x36   : > { %v187_v11 = vadd.f32 %v180_v10, %v179_v9  ;;  %v182_v14 = vld [vmem:[%s158_s17 + $0x18] sm:$0xff]  ;;  %s430_s17 = sshll.u32 %s637_s13, 3  ;;  %p560_p4 = scmp.lt.s32.totalorder %s811_s27, %s558_s23 }
  0x37   : > { %s324_s26 = sadd.s32 %s633_s12, %s430_s17  ;;  %p555_p0 = pnand %p554_p8, %p740_p9 }
  0x38   : > { %238 = vperm.xlu1 %520, %v186_v3   ;;  %228 = vperm.xlu0 %519, %v184_v4   ;;  %v188_v13 = vadd.f32 %v187_v11, %v181_v12  ;;  %s431_s3 = sshll.u32 %s324_s26, 7  ;;  %p561_p5 = scmp.lt.s32.totalorder %s559_s29, %s553_s4 }
  0x39   : > { %s816_s12 = scalar_lea.hbm %s871_s2, %s431_s3  ;;  %p556_p2 = pneg %p555_p0 }
  0x3a   : > { %v189_v15 = vadd.f32 %v188_v13, %v182_v14  ;;  %p562_p6 = por %p561_p5, %p560_p4 }
  0x3c   : > { %291 = vperm.xlu1 %520, %v426_v5   ;;  %286 = vperm.xlu0 %519, %v425_v6   ;;  %v190_v16 = vrot.slane %v189_v15, 4  ;;  %p563_p7 = pnand %p562_p6, %p556_p2 }
  0x3e   : > { %v191_v17 = vadd.f32 %v190_v16, %v189_v15 }
  0x40   : > { %301 = vperm.xlu1 %520, %v428_v7   ;;  %296 = vperm.xlu0 %519, %v427_v8   ;;  %v192_v18 = vrot.slane %v191_v17, 2 }
  0x42   : > { %v193_v19 = vadd.f32 %v192_v18, %v191_v17 }
  0x44   : > { %v194_v20 = vrot.slane %v193_v19, 1 }
  0x46   : > { %v195_v21 = vadd.f32 %v194_v20, %v193_v19 }
  0x48   : > { %v196_v22 = vmul.f32 0.03125, %v195_v21 }
  0x4a   : > { %v197_v23 = vsub.f32 %v179_v9, %v196_v22  ;;  %v198_v24 = vsub.f32 %v180_v10, %v196_v22  ;;  %v199_v25 = vsub.f32 %v181_v12, %v196_v22  ;;  %v200_v28 = vsub.f32 %v182_v14, %v196_v22 }
  0x4c   : > { %v201_v26 = vmul.f32 %v197_v23, %v197_v23  ;;  %v202_v27 = vmul.f32 %v198_v24, %v198_v24  ;;  %v203_v29 = vmul.f32 %v199_v25, %v199_v25  ;;  %v204_v31 = vmul.f32 %v200_v28, %v200_v28 }
  0x4e   : > { %v205_v30 = vadd.f32 %v202_v27, %v201_v26 }
  0x50   : > { %v206_v32 = vadd.f32 %v205_v30, %v203_v29 }
  0x52   : > { %v207_v33 = vadd.f32 %v206_v32, %v204_v31 }
  0x54   : > { %v208_v34 = vrot.slane %v207_v33, 4 }
  0x56   : > { %v209_v35 = vadd.f32 %v208_v34, %v207_v33 }
  0x58   : > { %v210_v36 = vrot.slane %v209_v35, 2 }
  0x5a   : > { %v211_v37 = vadd.f32 %v210_v36, %v209_v35 }
  0x5c   : > { %v212_v38 = vrot.slane %v211_v37, 1 }
  0x5e   : > { %v213_v39 = vadd.f32 %v212_v38, %v211_v37 }
  0x60   : > { %v214_v40 = vmul.f32 0.03125, %v213_v39 }
  0x62   : > { %v215_v41 = vadd.f32 1e-05, %v214_v40 }
  0x64   : > { %521 = vrsqrt.f32 %v215_v41 }
  0x71   : > { %v522_v42 = vpop.eup %521 }
  0x72   : > { %v217_v45 = vmul.f32 %v522_v42, %v179_v9  ;;  %v218_v46 = vmul.f32 %v522_v42, %v180_v10  ;;  %v219_v47 = vmul.f32 %v522_v42, %v181_v12  ;;  %v220_v50 = vmul.f32 %v522_v42, %v182_v14 }
  0xaf   : > { %v234_v43 = vpop.permute.xlu1 %233  ;;  %v224_v44 = vpop.permute.xlu0 %223 }
  0xb0   : > { %v241_v49 = vmul.f32 %v224_v44, %v217_v45  ;;  %v243_v53 = vmul.f32 %v234_v43, %v219_v47 }
  0xb3   : > { %v229_v48 = vpop.permute.xlu0 %228  ;;  %v239_v52 = vpop.permute.xlu1 %238 }
  0xb4   : > { %v242_v51 = vmul.f32 %v229_v48, %v218_v46  ;;  %v244_v55 = vmul.f32 %v239_v52, %v220_v50 }
  0xb6   : > { %v250_v54 = vadd.f32 %v242_v51, %v241_v49 }
  0xb7   : > { %v292_v20 = vpop.permute.xlu1 %291  ;;  %v287_v21 = vpop.permute.xlu0 %286 }
  0xb8   : > { %v251_v56 = vadd.f32 %v250_v54, %v243_v53 }
  0xba   : > { %v252_v57 = vadd.f32 %v251_v56, %v244_v55 }
  0xbb   : > { %v302_v27 = vpop.permute.xlu1 %301  ;;  %v297_v28 = vpop.permute.xlu0 %296 }
  0xbc   : > { %v253_v58 = vrot.slane %v252_v57, 4 }
  0xbe   : > { %v254_v59 = vadd.f32 %v253_v58, %v252_v57 }
  0xc0   : > { %v255_v60 = vrot.slane %v254_v59, 2 }
  0xc2   : > { %v256_v61 = vadd.f32 %v255_v60, %v254_v59 }
  0xc4   : > { %v257_v62 = vrot.slane %v256_v61, 1 }
  0xc6   : > { %v258_v63 = vadd.f32 %v257_v62, %v256_v61 }
  0xc8   : > { %v259_v0 = vmul.f32 0.03125, %v258_v63 }
  0xca   : > { %v260_v1 = vsub.f32 %v241_v49, %v259_v0  ;;  %v261_v2 = vsub.f32 %v242_v51, %v259_v0  ;;  %v262_v3 = vsub.f32 %v243_v53, %v259_v0  ;;  %v263_v4 = vsub.f32 %v244_v55, %v259_v0 }
  0xcc   : > { %v264_v5 = vmul.f32 %v260_v1, %v260_v1  ;;  %v265_v6 = vmul.f32 %v261_v2, %v261_v2  ;;  %v266_v7 = vmul.f32 %v262_v3, %v262_v3  ;;  %v267_v9 = vmul.f32 %v263_v4, %v263_v4 }
  0xce   : > { %v268_v8 = vadd.f32 %v265_v6, %v264_v5 }
  0xd0   : > { %v269_v10 = vadd.f32 %v268_v8, %v266_v7 }
  0xd2   : > { %v270_v11 = vadd.f32 %v269_v10, %v267_v9 }
  0xd4   : > { %v271_v12 = vrot.slane %v270_v11, 4 }
  0xd6   : > { %v272_v13 = vadd.f32 %v271_v12, %v270_v11 }
  0xd8   : > { %v273_v14 = vrot.slane %v272_v13, 2 }
  0xda   : > { %v274_v15 = vadd.f32 %v273_v14, %v272_v13 }
  0xdc   : > { %v275_v16 = vrot.slane %v274_v15, 1 }
  0xde   : > { %v276_v17 = vadd.f32 %v275_v16, %v274_v15 }
  0xe0   : > { %v277_v18 = vmul.f32 0.03125, %v276_v17 }
  0xe2   : > { %v278_v19 = vadd.f32 1e-05, %v277_v18 }
  0xe4   : > { %523 = vrsqrt.f32 %v278_v19 }
  0xf1   : > { %v524_v22 = vpop.eup %523 }
  0xf2   : > { %v281_v23 = vmul.f32 %v524_v22, %v242_v51  ;;  %v280_v24 = vmul.f32 %v524_v22, %v241_v49  ;;  %v283_v25 = vmul.f32 %v524_v22, %v244_v55  ;;  %v282_v26 = vmul.f32 %v524_v22, %v243_v53 }
  0xf4   : > { %v305_v29 = vmul.f32 %v292_v20, %v281_v23  ;;  %v304_v30 = vmul.f32 %v287_v21, %v280_v24  ;;  %v307_v31 = vmul.f32 %v302_v27, %v283_v25  ;;  %v306_v32 = vmul.f32 %v297_v28, %v282_v26 }
  0xf6   : > { %309 = vst [vmem:[%s178_s21 + $0x8] sm:$0xff] %v305_v29  ;;  %308 = vst [vmem:[%s178_s21] sm:$0xff] %v304_v30 }
  0xf7   : > { %311 = vst [vmem:[%s178_s21 + $0x18] sm:$0xff] %v307_v31  ;;  %310 = vst [vmem:[%s178_s21 + $0x10] sm:$0xff] %v306_v32 }
  0xf8   : > { %566 = shalt.err (!%p563_p7)
}
  0xf9   : > { %s567_s8 = scalar_lea.hbm %s816_s12, 512  ;;  %s571_s22 = scalar_lea.hbm %s871_s2, 2048 }
  0xfa   : > { %p568_p10 = scmp.ne.s32.totalorder %s816_s12, %s567_s8  ;;  %p572_p13 = scmp.lt.s32.totalorder %s816_s12, %s871_s2 }
  0xfb   : > { %p573_p1 = scmp.lt.s32.totalorder %s571_s22, %s567_s8 }
  0xfc   : > { %p569_p11 = pnand %p568_p10, %p740_p9 }
  0xfd   : > { %p574_p8 = por %p573_p1, %p572_p13 }
  0xfe   : > { %p570_p3 = pneg %p569_p11 }
 0x100   : > { %p575_p0 = pnand %p574_p8, %p570_p3 }
 0x102   : > { %578 = shalt.err (!%p575_p0)
}
 0x103   : > { %s657_s21 = smov 128   ;;  %s658_s3 = smov 256  }
 0x104   : > { %s659_s13 = smov 8  }
 0x105   : > { %436 = dma.vmem_to_hbm [thread:$0]  (%p740_p9), %s811_s27, 512, %s816_s12, %s313_s6, %s657_s21, %s658_s3, %s659_s13  }
 0x106 PF: > { %p447_p2 = scmp.ge.s32.totalorder %s649_s16, 2  ;;  %s342_s24 = sand.u32 1, %s621_s9  }
 0x107   : > { %s343_s4 = scalar_lea.sflag [#allocation4], %s342_s24 }
 0x108   : > { %p443_p4 = pnand %p447_p2, %p746_p12 }
 0x10a   : > { %p444_p5 = pneg %p443_p4 }
 0x10c   : > { %616 = dma.done.wait (%p444_p5), %s343_s4, 512  }
 0x10d   : > { %618 = vsyncadd (%p444_p5), %s343_s4, 4294966784  ;;  %s18_s16 = sadd.s32 1, %s649_s16   ;;  %s879_s25 = sld [smem:[#allocation8_spill]] }
 0x10e   : > { %p15_p6 = scmp.ge.s32.totalorder %s18_s16, 6   ;;  %s880_s9 = smov %s625_s10 }
 0x10f   : > { %s881_s10 = smov %s629_s11  ;;  %s882_s11 = smov %s753_s30 }
 0x110   : > { %s883_s12 = smov %s641_s14  ;;  %s884_s13 = smov %s645_s15 }
 0x111   : > { %s885_s14 = smov %s888_s19  ;;  %17 = sbr.rel (!%p15_p6) target bundleno = 7 (0x7), region = 74 }
 0x113   : > { %s886_s15 = smov %s879_s25 }
 0x116   :  { %348 = vsyncpa [#allocation3], 1 }
 0x117   :  { %350 = vsyncpa [#allocation3 + $0x1], 1 }
 0x118   :  { %351 = vsyncpa [#allocation4], 1 }
 0x119   :  { %353 = vsyncpa [#allocation4 + $0x1], 1 }

</bundles_post_ra>
